<compile_context>
chip_gen: v6e
topology: v6e:2x2x1
jax: 0.10.0
libtpu: 0.0.40
codegen_flags: <defaults>
</compile_context>

<pallas_src>
import functools

import jax
import jax.numpy as jnp
from jax import lax
from jax.experimental import pallas as pl
from jax.experimental.pallas import tpu as pltpu

ALPHA = 0.25
GAMMA = 2.0  # statically 2 -> explicit square in the kernel (no float pow)


def _focal_loss_kernel(x_ref, t_ref, o_ref, *, n_valid_rows):
    i = pl.program_id(0)
    tile_rows, n_cols = x_ref.shape

    x = x_ref[...].astype(jnp.float32)
    t = t_ref[...].astype(jnp.float32)

    # One EUP exp per element, shared by the stable sigmoid and the stable
    # BCE-with-logits log term (instead of separate sigmoid + log1p(exp) exps).
    e = jnp.exp(-jnp.abs(x))
    inv = 1.0 / (1.0 + e)  # exact; pl.reciprocal(..., approx=True) if looser tol is OK
    p = jnp.where(x >= 0.0, inv, e * inv)                 # sigmoid(x)
    bce = jnp.maximum(x, 0.0) - x * t + jnp.log1p(e)      # BCE-with-logits, 'none'

    pt = p * t + (1.0 - p) * (1.0 - t)
    d = 1.0 - pt
    alpha_t = ALPHA * t + (1.0 - ALPHA) * (1.0 - t)
    loss = alpha_t * bce * (d * d)                        # gamma == 2: two VPU muls

    # Mask rows of the (possibly partial) last tile / padded batch.
    row_ids = lax.broadcasted_iota(jnp.int32, (tile_rows, n_cols), 0) + i * tile_rows
    loss = jnp.where(row_ids < n_valid_rows, loss, 0.0)

    # Per-tile partial sums: fold sublane groups only (pure VPU adds); the full
    # cross-lane reduction and the mean are done once in the wrapper.
    o_ref[...] = jnp.sum(loss.reshape(tile_rows // 8, 8, n_cols), axis=0)


def focal_loss(inputs, targets, *,
               target_block_bytes=2 * 1024 * 1024,
               vmem_limit_bytes=32 * 1024 * 1024):
    """Mean focal loss over (batch, num_classes) logits / same-shape targets.

    Accepts f32/bf16 logits and f32/bf16/int/bool targets; all math is f32
    inside the kernel.  Only reduction='mean' (the module default) is computed.
    """
    assert inputs.shape == targets.shape and inputs.ndim == 2
    B, C = inputs.shape
    n_total = B * C

    # Tiny batches: pad up to one sublane group (padded rows are masked out).
    if B < 8:
        pad = 8 - B
        inputs = jnp.pad(inputs, ((0, pad), (0, 0)))
        targets = jnp.pad(targets, ((0, pad), (0, 0)))
    b_padded = max(B, 8)

    # Row-tile sizing: ~target_block_bytes of f32 work per input block,
    # multiple of 8, clamped to the batch.  Intermediates are f32 -> 4 B/elem.
    rows_budget = max(8, (target_block_bytes // (C * 4)) // 8 * 8)
    tile_rows = min(rows_budget, (b_padded // 8) * 8)
    num_tiles = pl.cdiv(b_padded, tile_rows)
    # TODO(synk): add a column tile (multiple of 128) + 2-D grid for extremely
    # large num_classes (when 8 * C * 4 bytes alone would blow the VMEM budget).

    kernel = functools.partial(_focal_loss_kernel, n_valid_rows=B)

    partials = pl.pallas_call(
        kernel,
        out_shape=jax.ShapeDtypeStruct((num_tiles * 8, C), jnp.float32),
        grid_spec=pltpu.PrefetchScalarGridSpec(
            num_scalar_prefetch=0,
            grid=(num_tiles,),
            in_specs=[
                pl.BlockSpec((tile_rows, C), lambda i: (i, 0)),
                pl.BlockSpec((tile_rows, C), lambda i: (i, 0)),
            ],
            out_specs=pl.BlockSpec((8, C), lambda i: (i, 0)),
        ),
        compiler_params=pltpu.CompilerParams(
            # Each program writes its own output block -> no resident
            # accumulator, so the grid axis is parallel (2 TCs on v7x).
            dimension_semantics=("parallel",),
            # Cover 2 inputs x 2 pipeline buffers x block + f32 temporaries;
            # within scoped VMEM on v5e/v6e/v7x.
            vmem_limit_bytes=vmem_limit_bytes,
        ),
    )(inputs, targets)

    # reduction='mean'
    return jnp.sum(partials) / jnp.float32(n_total)


def focal_loss_ref(inputs, targets):
    """Pure-JAX reference matching the PyTorch module (reduction='mean')."""
    x = inputs.astype(jnp.float32)
    t = targets.astype(jnp.float32)
    p = jax.nn.sigmoid(x)
    bce = jnp.maximum(x, 0.0) - x * t + jnp.log1p(jnp.exp(-jnp.abs(x)))
    pt = p * t + (1.0 - p) * (1.0 - t)
    loss = bce * (1.0 - pt) ** GAMMA
    alpha_t = ALPHA * t + (1.0 - ALPHA) * (1.0 - t)
    return jnp.mean(alpha_t * loss)


if __name__ == "__main__":
    key = jax.random.PRNGKey(0)

    # Case 1: f32 logits/targets, batch divisible by 8.
    k1, k2, key = jax.random.split(key, 3)
    b, c = 64, 128
    logits = jax.random.normal(k1, (b, c), dtype=jnp.float32) * 2.0
    tgts = (jax.random.uniform(k2, (b, c)) < 0.3).astype(jnp.float32)
    out = jax.block_until_ready(focal_loss(logits, tgts))
    ref = focal_loss_ref(logits, tgts)
    assert jnp.allclose(out, ref, rtol=1e-5, atol=1e-6), ("case1", out, ref)

    # Case 2: batch not a multiple of the tile (exercises cdiv grid + row mask).
    k1, k2, key = jax.random.split(key, 3)
    b, c = 37, 128
    logits = jax.random.normal(k1, (b, c), dtype=jnp.float32) * 2.0
    tgts = (jax.random.uniform(k2, (b, c)) < 0.3).astype(jnp.float32)
    out = jax.block_until_ready(focal_loss(logits, tgts))
    ref = focal_loss_ref(logits, tgts)
    assert jnp.allclose(out, ref, rtol=1e-5, atol=1e-6), ("case2", out, ref)

    # Case 3: narrow input dtypes (bf16 logits / bf16 targets); f32 math inside.
    k1, k2, key = jax.random.split(key, 3)
    b, c = 48, 256
    logits = (jax.random.normal(k1, (b, c), dtype=jnp.float32) * 2.0).astype(jnp.bfloat16)
    tgts = (jax.random.uniform(k2, (b, c)) < 0.3).astype(jnp.bfloat16)
    out = jax.block_until_ready(focal_loss(logits, tgts))
    ref = focal_loss_ref(logits, tgts)  # reference sees the same bf16 values
    assert jnp.allclose(out, ref, rtol=1e-5, atol=1e-6), ("case3", out, ref)

    print("KERNEL_OK")
</pallas_src>

<mosaic_0001>
module attributes {stable_mosaic.version = 11 : i64} {
  func.func @_focal_loss_kernel(%arg0: i32, %arg1: memref<64x128xf32, #tpu.memory_space<vmem>>, %arg2: memref<64x128xf32, #tpu.memory_space<vmem>>, %arg3: memref<8x128xf32, #tpu.memory_space<vmem>>) attributes {dimension_semantics = [#tpu.dimension_semantics<parallel>], iteration_bounds = array<i64: 1>, scalar_prefetch = 0 : i64, scratch_operands = 0 : i64, tpu.core_type = #tpu.core_type<tc>, window_params = [{transform_indices = @transform_0, window_bounds = array<i64: 64, 128>}, {transform_indices = @transform_1, window_bounds = array<i64: 64, 128>}, {transform_indices = @transform_2, window_bounds = array<i64: 8, 128>}]} {
    %c0 = arith.constant 0 : index
    %c0_0 = arith.constant 0 : index
    %0 = vector.load %arg1[%c0, %c0_0] : memref<64x128xf32, #tpu.memory_space<vmem>>, vector<64x128xf32>
    %c0_1 = arith.constant 0 : index
    %c0_2 = arith.constant 0 : index
    %1 = vector.load %arg2[%c0_1, %c0_2] : memref<64x128xf32, #tpu.memory_space<vmem>>, vector<64x128xf32>
    %2 = math.absf %0 : vector<64x128xf32>
    %cst = arith.constant 0.000000e+00 : f32
    %3 = vector.broadcast %cst : f32 to vector<64x128xf32>
    %4 = arith.subf %3, %2 : vector<64x128xf32>
    %5 = math.exp %4 : vector<64x128xf32>
    %cst_3 = arith.constant 1.000000e+00 : f32
    %6 = vector.broadcast %cst_3 : f32 to vector<64x128xf32>
    %7 = arith.addf %6, %5 : vector<64x128xf32>
    %cst_4 = arith.constant 1.000000e+00 : f32
    %8 = vector.broadcast %cst_4 : f32 to vector<64x128xf32>
    %9 = arith.divf %8, %7 : vector<64x128xf32>
    %cst_5 = arith.constant 0.000000e+00 : f32
    %10 = vector.broadcast %cst_5 : f32 to vector<64x128xf32>
    %11 = arith.cmpf oge, %0, %10 : vector<64x128xf32>
    %12 = arith.mulf %5, %9 : vector<64x128xf32>
    %13 = arith.select %11, %9, %12 : vector<64x128xi1>, vector<64x128xf32>
    %cst_6 = arith.constant 0.000000e+00 : f32
    %14 = vector.broadcast %cst_6 : f32 to vector<64x128xf32>
    %15 = arith.maximumf %0, %14 : vector<64x128xf32>
    %16 = arith.mulf %0, %1 : vector<64x128xf32>
    %17 = arith.subf %15, %16 : vector<64x128xf32>
    %18 = math.log1p %5 : vector<64x128xf32>
    %19 = arith.addf %17, %18 : vector<64x128xf32>
    %20 = arith.mulf %13, %1 : vector<64x128xf32>
    %cst_7 = arith.constant 1.000000e+00 : f32
    %21 = vector.broadcast %cst_7 : f32 to vector<64x128xf32>
    %22 = arith.subf %21, %13 : vector<64x128xf32>
    %cst_8 = arith.constant 1.000000e+00 : f32
    %23 = vector.broadcast %cst_8 : f32 to vector<64x128xf32>
    %24 = arith.subf %23, %1 : vector<64x128xf32>
    %25 = arith.mulf %22, %24 : vector<64x128xf32>
    %26 = arith.addf %20, %25 : vector<64x128xf32>
    %cst_9 = arith.constant 1.000000e+00 : f32
    %27 = vector.broadcast %cst_9 : f32 to vector<64x128xf32>
    %28 = arith.subf %27, %26 : vector<64x128xf32>
    %cst_10 = arith.constant 2.500000e-01 : f32
    %29 = vector.broadcast %cst_10 : f32 to vector<64x128xf32>
    %30 = arith.mulf %29, %1 : vector<64x128xf32>
    %cst_11 = arith.constant 1.000000e+00 : f32
    %31 = vector.broadcast %cst_11 : f32 to vector<64x128xf32>
    %32 = arith.subf %31, %1 : vector<64x128xf32>
    %cst_12 = arith.constant 7.500000e-01 : f32
    %33 = vector.broadcast %cst_12 : f32 to vector<64x128xf32>
    %34 = arith.mulf %33, %32 : vector<64x128xf32>
    %35 = arith.addf %30, %34 : vector<64x128xf32>
    %36 = arith.mulf %35, %19 : vector<64x128xf32>
    %37 = arith.mulf %28, %28 : vector<64x128xf32>
    %38 = arith.mulf %36, %37 : vector<64x128xf32>
    %39 = tpu.iota {dimensions = array<i32: 0>} : vector<64x128xi32>
    %c64_i32 = arith.constant 64 : i32
    %40 = arith.muli %arg0, %c64_i32 : i32
    %41 = vector.broadcast %40 : i32 to vector<64x128xi32>
    %42 = arith.addi %39, %41 : vector<64x128xi32>
    %c64_i32_13 = arith.constant 64 : i32
    %43 = vector.broadcast %c64_i32_13 : i32 to vector<64x128xi32>
    %44 = arith.cmpi slt, %42, %43 : vector<64x128xi32>
    %cst_14 = arith.constant 0.000000e+00 : f32
    %45 = vector.broadcast %cst_14 : f32 to vector<64x128xf32>
    %46 = arith.select %44, %38, %45 : vector<64x128xi1>, vector<64x128xf32>
    %47 = vector.shape_cast %46 : vector<64x128xf32> to vector<8x8x128xf32>
    %cst_15 = arith.constant dense<0.000000e+00> : vector<8x128xf32>
    %48 = vector.multi_reduction <add>, %47, %cst_15 [0] : vector<8x8x128xf32> to vector<8x128xf32>
    %c0_16 = arith.constant 0 : index
    %c0_17 = arith.constant 0 : index
    %49 = vector.load %arg3[%c0_16, %c0_17] : memref<8x128xf32, #tpu.memory_space<vmem>>, vector<8x128xf32>
    tpu.vector_store %arg3[%c0_16, %c0_17], %48 {strides = array<i32>} : memref<8x128xf32, #tpu.memory_space<vmem>>, vector<8x128xf32>,
    return
  }
  func.func @transform_0(%arg0: i32) -> (i32, i32) {
    %c0_i32 = arith.constant 0 : i32
    %c0_i32_0 = arith.constant 0 : i32
    return %arg0, %c0_i32 : i32, i32
  }
  func.func @transform_1(%arg0: i32) -> (i32, i32) {
    %c0_i32 = arith.constant 0 : i32
    %c0_i32_0 = arith.constant 0 : i32
    return %arg0, %c0_i32 : i32, i32
  }
  func.func @transform_2(%arg0: i32) -> (i32, i32) {
    %c0_i32 = arith.constant 0 : i32
    %c0_i32_0 = arith.constant 0 : i32
    return %arg0, %c0_i32 : i32, i32
  }
}

</mosaic_0001>

<bundles_post_ra>
// kernel: tpu_custom_call.1
= control target key start
LH: loop header
LB: loop body
LE: loop exit
PB: predicated region body
PF: predicated region fallthrough
CT: control target
= control target key end

     0   :  { %7 = vsyncpa [#allocation3], 0  ;;  %s896_s0 = inlined_call_operand.hbm [shape: f32[64,128], index: 0, kind: input, shape index: {}]   ;;  %s897_s1 = inlined_call_operand.hbm [shape: f32[64,128], index: 1, kind: input, shape index: {}]   ;;  %s898_s2 = inlined_call_operand.hbm [shape: f32[8,128], index: 2, kind: output, shape index: {}]  }
   0x1   :  { %8 = vsyncpa [#allocation6], 0 }
   0x2   :  { %9 = vsyncpa [#allocation4], 0  ;;  %s514_s9 = smov [#allocation2]  }
   0x3   :  { %s15_s10 = sshll.u32 %s514_s9, 4  ;;  %s16_s10 = int_to_ptr.vmem [resolvable:$true] %s15_s10 }
   0x4   :  { %s456_s11 = scalar_lea.vmem %s16_s10, 1024  ;;  %p461_p1 = scmp.lt.s32.totalorder %s16_s10, %s16_s10 }
   0x5   :  { %p457_p0 = scmp.ne.s32.totalorder %s16_s10, %s456_s11  ;;  %p462_p2 = scmp.lt.s32.totalorder %s456_s11, %s456_s11 }
   0x7   :  { %p463_p3 = por %p462_p2, %p461_p1 }
   0x9   :  { %p464_p4 = pnand %p463_p3, %p457_p0 }
   0xb   :  { %467 = shalt.err (!%p464_p4)
}
   0xc   :  { %s515_s12 = smov 128   ;;  %s516_s13 = smov 8  }
   0xd   :  { %21 = dma.hbm_to_vmem [thread:$0]  %s896_s0, 1024, %s16_s10, [#allocation3], %s515_s12, %s515_s12, %s516_s13  }
   0xe   :  { %s517_s16 = smov [#allocation5]  }
   0xf   :  { %s27_s17 = sshll.u32 %s517_s16, 4  ;;  %s28_s17 = int_to_ptr.vmem [resolvable:$true] %s27_s17 }
  0x10   :  { %s476_s18 = scalar_lea.vmem %s28_s17, 1024  ;;  %p481_p6 = scmp.lt.s32.totalorder %s28_s17, %s28_s17 }
  0x11   :  { %p477_p5 = scmp.ne.s32.totalorder %s28_s17, %s476_s18  ;;  %p482_p7 = scmp.lt.s32.totalorder %s476_s18, %s476_s18 }
  0x13   :  { %p483_p8 = por %p482_p7, %p481_p6 }
  0x15   :  { %p484_p9 = pnand %p483_p8, %p477_p5 }
  0x17   :  { %487 = shalt.err (!%p484_p9)
}
  0x18   :  { %33 = dma.hbm_to_vmem [thread:$0]  %s897_s1, 1024, %s28_s17, [#allocation6], %s515_s12, %s515_s12, %s516_s13  }
  0x19   :  { %508 = dma.done.wait [#allocation3], 1024  }
  0x1a   :  { %509 = vsyncadd [#allocation3], 4294966272 }
  0x1b   :  { %510 = dma.done.wait [#allocation6], 1024  }
  0x1c   :  { %511 = vsyncadd [#allocation6], 4294966272  ;;  %v540_v0 = vld [vmem:[#allocation2] sm:$0xff]  ;;  %v542_v1 = vld [vmem:[#allocation2 + $0x8] sm:$0xff]  ;;  %s518_s0 = smov [#allocation7]  }
  0x1d   :  { %v544_v2 = vld [vmem:[#allocation2 + $0x10] sm:$0xff]  ;;  %v546_v3 = vld [vmem:[#allocation2 + $0x18] sm:$0xff]  ;;  %v56_v4 = vand.u32 2147483647, %v540_v0  ;;  %v549_v5 = vld [vmem:[#allocation2 + $0x20] sm:$0xff]  ;;  %v136_v38 = vmax.f32 %v540_v0, 0.0 }
  0x1e   :  { %v551_v6 = vld [vmem:[#allocation2 + $0x28] sm:$0xff]  ;;  %v57_v7 = vand.u32 2147483647, %v542_v1  ;;  %v554_v8 = vld [vmem:[#allocation2 + $0x30] sm:$0xff]  ;;  %v556_v9 = vld [vmem:[#allocation2 + $0x38] sm:$0xff]  ;;  %v137_v43 = vmax.f32 %v542_v1, 0.0 }
  0x1f   :  { %v58_v10 = vand.u32 2147483647, %v544_v2  ;;  %v64_v11 = vsub.f32 0.0, %v56_v4  ;;  %v59_v12 = vand.u32 2147483647, %v546_v3  ;;  %v564_v32 = vld [vmem:[#allocation5] sm:$0xff] }
  0x20   :  { %v65_v13 = vsub.f32 0.0, %v57_v7  ;;  %v60_v14 = vand.u32 2147483647, %v549_v5  ;;  %v61_v15 = vand.u32 2147483647, %v551_v6  ;;  %v566_v33 = vld [vmem:[#allocation5 + $0x8] sm:$0xff]  ;;  %v144_v36 = vmul.f32 %v564_v32, %v540_v0 }
  0x21   :  { %v66_v16 = vsub.f32 0.0, %v58_v10  ;;  %v62_v17 = vand.u32 2147483647, %v554_v8  ;;  %v63_v18 = vand.u32 2147483647, %v556_v9  ;;  %v67_v19 = vsub.f32 0.0, %v59_v12 }
  0x22   :  { %v68_v20 = vsub.f32 0.0, %v60_v14  ;;  %v69_v21 = vsub.f32 0.0, %v61_v15  ;;  %v72_v22 = vmul.f32 1.442695, %v64_v11  ;;  %v74_v23 = vmul.f32 1.442695, %v65_v13 }
  0x23   :  { %v70_v24 = vsub.f32 0.0, %v62_v17  ;;  %v71_v25 = vsub.f32 0.0, %v63_v18  ;;  %v76_v26 = vmul.f32 1.442695, %v66_v16  ;;  %v78_v27 = vmul.f32 1.442695, %v67_v19 }
  0x24   :  { %400 = vpow2.f32 %v72_v22  ;;  %v80_v28 = vmul.f32 1.442695, %v68_v20  ;;  %v82_v29 = vmul.f32 1.442695, %v69_v21  ;;  %v568_v34 = vld [vmem:[#allocation5 + $0x10] sm:$0xff]  ;;  %v570_v35 = vld [vmem:[#allocation5 + $0x18] sm:$0xff]  ;;  %v145_v37 = vmul.f32 %v566_v33, %v542_v1 }
  0x25   :  { %402 = vpow2.f32 %v74_v23  ;;  %v84_v30 = vmul.f32 1.442695, %v70_v24  ;;  %v86_v31 = vmul.f32 1.442695, %v71_v25  ;;  %v146_v39 = vmul.f32 %v568_v34, %v544_v2  ;;  %v581_v41 = vld [vmem:[#allocation5 + $0x20] sm:$0xff]  ;;  %v583_v42 = vld [vmem:[#allocation5 + $0x28] sm:$0xff] }
  0x26   :  { %404 = vpow2.f32 %v76_v26  ;;  %v147_v40 = vmul.f32 %v570_v35, %v546_v3  ;;  %v138_v44 = vmax.f32 %v544_v2, 0.0  ;;  %v139_v45 = vmax.f32 %v546_v3, 0.0  ;;  %v588_v46 = vld [vmem:[#allocation5 + $0x30] sm:$0xff]  ;;  %v590_v47 = vld [vmem:[#allocation5 + $0x38] sm:$0xff]  ;;  %s385_s1 = sshll.u32 %s518_s0, 4  ;;  %s386_s1 = int_to_ptr.vmem [resolvable:$true] %s385_s1 }
  0x27   :  { %406 = vpow2.f32 %v78_v27  ;;  %v140_v48 = vmax.f32 %v549_v5, 0.0  ;;  %v141_v49 = vmax.f32 %v551_v6, 0.0  ;;  %v148_v50 = vmul.f32 %v581_v41, %v549_v5  ;;  %s488_s21 = scalar_lea.vmem %s386_s1, 128  ;;  %p493_p11 = scmp.lt.s32.totalorder %s386_s1, %s386_s1 }
  0x28   :  { %408 = vpow2.f32 %v80_v28  ;;  %v149_v51 = vmul.f32 %v583_v42, %v551_v6  ;;  %v142_v52 = vmax.f32 %v554_v8, 0.0  ;;  %v143_v53 = vmax.f32 %v556_v9, 0.0  ;;  %p489_p10 = scmp.ne.s32.totalorder %s386_s1, %s488_s21  ;;  %p494_p12 = scmp.lt.s32.totalorder %s488_s21, %s488_s21 }
  0x29   :  { %410 = vpow2.f32 %v82_v29  ;;  %v150_v54 = vmul.f32 %v588_v46, %v554_v8  ;;  %v151_v55 = vmul.f32 %v590_v47, %v556_v9  ;;  %v604_v56 = vsub.f32 %v136_v38, %v144_v36 }
  0x2a   :  { %412 = vpow2.f32 %v84_v30  ;;  %v606_v57 = vsub.f32 %v137_v43, %v145_v37  ;;  %v608_v58 = vsub.f32 %v138_v44, %v146_v39  ;;  %v610_v59 = vsub.f32 %v139_v45, %v147_v40  ;;  %p495_p13 = por %p494_p12, %p493_p11 }
  0x2b   :  { %414 = vpow2.f32 %v86_v31  ;;  %v612_v60 = vsub.f32 %v140_v48, %v148_v50  ;;  %v614_v61 = vsub.f32 %v141_v49, %v149_v51  ;;  %v618_v63 = vsub.f32 %v142_v52, %v150_v54 }
  0x2c   :  { %v620_v4 = vsub.f32 %v143_v53, %v151_v55  ;;  %v899_v7 = vsub.f32 1.0, %v564_v32  ;;  %v900_v10 = vsub.f32 1.0, %v566_v33  ;;  %v901_v13 = vsub.f32 1.0, %v568_v34  ;;  %p496_p0 = pnand %p495_p13, %p489_p10 }
  0x2d   :  { %903 = vst [vmem:[#allocation11_spill] sm:$0xff] %v612_v60  ;;  %904 = vst [vmem:[#allocation12_spill] sm:$0xff] %v614_v61  ;;  %v902_v14 = vsub.f32 1.0, %v570_v35  ;;  %v640_v23 = vmul.f32 0.25, %v564_v32  ;;  %v643_v24 = vmul.f32 0.25, %v566_v33  ;;  %v649_v27 = vmul.f32 0.25, %v568_v34 }
  0x2e   :  { %905 = vst [vmem:[#allocation13_spill] sm:$0xff] %v618_v63  ;;  %906 = vst [vmem:[#allocation14_spill] sm:$0xff] %v620_v4  ;;  %v652_v28 = vmul.f32 0.25, %v570_v35  ;;  %v659_v36 = vmul.f32 0.25, %v581_v41  ;;  %v666_v40 = vmul.f32 0.25, %v583_v42  ;;  %v672_v45 = vmul.f32 0.25, %v588_v46 }
  0x2f   :  { %v675_v48 = vmul.f32 0.25, %v590_v47  ;;  %v681_v51 = vmul.f32 0.75, %v899_v7  ;;  %v686_v54 = vmul.f32 0.75, %v900_v10  ;;  %vm112_vm0 = vcmp.ge.f32.partialorder %v540_v0, 0.0 }
  0x30   :  { %907 = vst [vmem:[#allocation15_spill] sm:$0xff] %v652_v28  ;;  %908 = vst [vmem:[#allocation16_spill] sm:$0xff] %v659_v36  ;;  %v692_v19 = vmul.f32 0.75, %v901_v13  ;;  %vm113_vm1 = vcmp.ge.f32.partialorder %v542_v1, 0.0  ;;  %v699_v10 = vmul.f32 0.75, %v902_v14  ;;  %vm114_vm2 = vcmp.ge.f32.partialorder %v544_v2, 0.0 }
  0x31   :  { %v616_v62 = vpop.eup %400  ;;  %909 = vst [vmem:[#allocation17_spill] sm:$0xff] %v666_v40  ;;  %910 = vst [vmem:[#allocation18_spill] sm:$0xff] %v672_v45  ;;  %vm115_vm3 = vcmp.ge.f32.partialorder %v546_v3, 0.0  ;;  %vm116_vm4 = vcmp.ge.f32.partialorder %v549_v5, 0.0  ;;  %v913_v14 = vsub.f32 1.0, %v581_v41  ;;  %vm117_vm5 = vcmp.ge.f32.partialorder %v551_v6, 0.0 }
  0x32   :  { %v624_v11 = vpop.eup %402  ;;  %v88_v12 = vadd.f32 1.0, %v616_v62  ;;  %v163_v31 = vmul.f32 -0.5, %v616_v62  ;;  %911 = vst [vmem:[#allocation19_spill] sm:$0xff] %v675_v48  ;;  %912 = vst [vmem:[#allocation20_spill] sm:$0xff] %v699_v10  ;;  %vm118_vm6 = vcmp.ge.f32.partialorder %v554_v8, 0.0  ;;  %vm119_vm7 = vcmp.ge.f32.partialorder %v556_v9, 0.0 }
  0x33   :  { %v630_v16 = vpop.eup %404  ;;  %v89_v17 = vadd.f32 1.0, %v624_v11  ;;  %v172_v39 = vmul.f32 -0.5, %v624_v11  ;;  %v711_v48 = vmul.f32 0.75, %v913_v14  ;;  %v937_v9 = vsub.f32 1.0, %v564_v32 }
  0x34   :  { %v636_v21 = vpop.eup %406  ;;  %v90_v22 = vadd.f32 1.0, %v630_v16  ;;  %416 = vrcp.f32 %v88_v12  ;;  %v181_v50 = vmul.f32 -0.5, %v630_v16  ;;  %v164_v52 = vadd.f32 1.0, %v163_v31 }
  0x35   :  { %v645_v25 = vpop.eup %408  ;;  %v91_v26 = vadd.f32 1.0, %v636_v21  ;;  %418 = vrcp.f32 %v89_v17  ;;  %v190_v53 = vmul.f32 -0.5, %v636_v21  ;;  %v173_v55 = vadd.f32 1.0, %v172_v39  ;;  %914 = vst [vmem:[#allocation21_spill] sm:$0xff] %v711_v48 }
  0x36   :  { %v654_v29 = vpop.eup %410  ;;  %v92_v30 = vadd.f32 1.0, %v645_v25  ;;  %420 = vrcp.f32 %v90_v22  ;;  %v199_v20 = vmul.f32 -0.5, %v645_v25  ;;  %v166_v31 = vand.u32 2147483647, %v616_v62 }
  0x37   :  { %v661_v37 = vpop.eup %412  ;;  %v93_v38 = vadd.f32 1.0, %v654_v29  ;;  %422 = vrcp.f32 %v91_v26  ;;  %v208_v7 = vmul.f32 -0.5, %v654_v29  ;;  %v175_v39 = vand.u32 2147483647, %v624_v11 }
  0x38   :  { %v668_v43 = vpop.eup %414  ;;  %v94_v44 = vadd.f32 1.0, %v661_v37  ;;  %424 = vrcp.f32 %v92_v30  ;;  %v182_v13 = vadd.f32 1.0, %v181_v50  ;;  %v217_v18 = vmul.f32 -0.5, %v661_v37 }
  0x39   :  { %v95_v49 = vadd.f32 1.0, %v668_v43  ;;  %426 = vrcp.f32 %v93_v38  ;;  %v191_v15 = vadd.f32 1.0, %v190_v53  ;;  %v200_v50 = vadd.f32 1.0, %v199_v20 }
  0x3a   :  { %428 = vrcp.f32 %v94_v44  ;;  %v226_v4 = vmul.f32 -0.5, %v668_v43  ;;  %v184_v45 = vand.u32 2147483647, %v630_v16  ;;  %v722_v14 = vmul.f32 %v630_v16, %v182_v13 }
  0x3b   :  { %430 = vrcp.f32 %v95_v49  ;;  %v202_v40 = vand.u32 2147483647, %v645_v25  ;;  %v728_v63 = vmul.f32 %v636_v21, %v191_v15  ;;  %vm731_vm8 = vcmp.lt.f32.partialorder %v166_v31, 0.0004427343 }
  0x3c   :  { %432 = vlog2.f32 %v88_v12  ;;  %v707_v12 = vmul.f32 %v616_v62, %v164_v52  ;;  %v193_v52 = vand.u32 2147483647, %v636_v21  ;;  %vm746_vm9 = vcmp.lt.f32.partialorder %v175_v39, 0.0004427343 }
  0x3d   :  { %434 = vlog2.f32 %v89_v17  ;;  %v715_v17 = vmul.f32 %v624_v11, %v173_v55  ;;  %v218_v55 = vadd.f32 1.0, %v217_v18  ;;  %v211_v18 = vand.u32 2147483647, %v654_v29 }
  0x3e   :  { %436 = vlog2.f32 %v90_v22  ;;  %v209_v22 = vadd.f32 1.0, %v208_v7  ;;  %v227_v7 = vadd.f32 1.0, %v226_v4  ;;  %v220_v4 = vand.u32 2147483647, %v661_v37 }
  0x3f   :  { %438 = vlog2.f32 %v91_v26  ;;  %vm764_vm10 = vcmp.lt.f32.partialorder %v184_v45, 0.0004427343  ;;  %vm778_vm11 = vcmp.lt.f32.partialorder %v193_v52, 0.0004427343  ;;  %vm782_vm12 = vcmp.lt.f32.partialorder %v202_v40, 0.0004427343 }
  0x40   :  { %440 = vlog2.f32 %v92_v30  ;;  %v741_v15 = vmul.f32 %v654_v29, %v209_v22  ;;  %v922_v22 = vsub.f32 1.0, %v588_v46  ;;  %vm799_vm13 = vcmp.lt.f32.partialorder %v211_v18, 0.0004427343  ;;  %v946_v52 = vld [vmem:[#allocation12_spill] sm:$0xff] }
  0x41   :  { %v417_v53 = vpop.eup %416  ;;  %442 = vlog2.f32 %v93_v38  ;;  %v736_v38 = vmul.f32 %v645_v25, %v200_v50  ;;  %v751_v50 = vmul.f32 %v661_v37, %v218_v55  ;;  %v769_v55 = vmul.f32 %v668_v43, %v227_v7 }
  0x42   :  { %v419_v26 = vpop.eup %418  ;;  %v120_v20 = vmul.f32 %v417_v53, %v616_v62  ;;  %444 = vlog2.f32 %v94_v44  ;;  %v759_v28 = vmul.f32 0.75, %v922_v22  ;;  %vm814_vm14 = vcmp.lt.f32.partialorder %v220_v4, 0.0004427343 }
  0x43   :  { %v421_v30 = vpop.eup %420  ;;  %v121_v48 = vmul.f32 %v419_v26, %v624_v11  ;;  %446 = vlog2.f32 %v95_v49  ;;  %v229_v11 = vand.u32 2147483647, %v668_v43  ;;  %919 = vst [vmem:[#allocation22_spill] sm:$0xff] %v751_v50  ;;  %v920_v49 = vsub.f32 1.0, %v583_v42 }
  0x44   :  { %v423_v36 = vpop.eup %422  ;;  %v122_v62 = vmul.f32 %v421_v30, %v630_v16  ;;  %v938_v13 = vsub.f32 1.0, %v566_v33 }
  0x45   :  { %v425_v44 = vpop.eup %424  ;;  %v123_v31 = vmul.f32 %v423_v36, %v636_v21  ;;  %v755_v16 = vmul.f32 0.75, %v920_v49  ;;  %v128_v21 = vsel %vm112_vm0, %v417_v53, %v120_v20  ;;  %v925_v49 = vsub.f32 1.0, %v590_v47 }
  0x46   :  { %v427_v61 = vpop.eup %426  ;;  %v124_v60 = vmul.f32 %v425_v44, %v645_v25  ;;  %v129_v25 = vsel %vm113_vm1, %v419_v26, %v121_v48  ;;  %v788_v53 = vadd.f32 %v681_v51, %v640_v23  ;;  %v792_v20 = vadd.f32 %v686_v54, %v643_v24 }
  0x47   :  { %921 = vst [vmem:[#allocation23_spill] sm:$0xff] %v755_v16  ;;  %v773_v16 = vmul.f32 0.75, %v925_v49  ;;  %v429_v50 = vpop.eup %428  ;;  %v125_v22 = vmul.f32 %v427_v61, %v654_v29  ;;  %v130_v48 = vsel %vm114_vm2, %v421_v30, %v122_v62  ;;  %v131_v40 = vsel %vm115_vm3, %v423_v36, %v123_v31 }
  0x48   :  { %v431_v29 = vpop.eup %430  ;;  %v126_v1 = vmul.f32 %v429_v50, %v661_v37  ;;  %v805_v23 = vadd.f32 %v692_v19, %v649_v27  ;;  %v132_v37 = vsel %vm116_vm4, %v425_v44, %v124_v60  ;;  %v240_v2 = vmul.f32 %v128_v21, %v564_v32  ;;  %v950_v19 = vld [vmem:[#allocation16_spill] sm:$0xff]  ;;  %v952_v44 = vld [vmem:[#allocation13_spill] sm:$0xff] }
  0x49   :  { %926 = vst [vmem:[#allocation24_spill] sm:$0xff] %v773_v16  ;;  %v433_v51 = vpop.eup %432  ;;  %v127_v24 = vmul.f32 %v431_v29, %v668_v43  ;;  %v248_v54 = vsub.f32 1.0, %v128_v21  ;;  %v133_v3 = vsel %vm117_vm5, %v427_v61, %v125_v22  ;;  %v241_v7 = vmul.f32 %v129_v25, %v566_v33 }
  0x4a   :  { %v435_v26 = vpop.eup %434  ;;  %v162_v36 = vmul.f32 0.6931472, %v433_v51  ;;  %v249_v30 = vsub.f32 1.0, %v129_v25  ;;  %v242_v27 = vmul.f32 %v130_v48, %v568_v34  ;;  %v243_v5 = vmul.f32 %v131_v40, %v570_v35 }
  0x4b   :  { %v437_v18 = vpop.eup %436  ;;  %v250_v60 = vsub.f32 1.0, %v130_v48  ;;  %v251_v43 = vsub.f32 1.0, %v131_v40  ;;  %v134_v6 = vsel %vm118_vm6, %v429_v50, %v126_v1  ;;  %v171_v61 = vmul.f32 0.6931472, %v435_v26 }
  0x4c   :  { %v439_v62 = vpop.eup %438  ;;  %vm822_vm15 = vcmp.lt.f32.partialorder %v229_v11, 0.0004427343  ;;  %v244_v4 = vmul.f32 %v132_v37, %v581_v41  ;;  %v252_v31 = vsub.f32 1.0, %v132_v37  ;;  %v135_v49 = vsel %vm119_vm7, %v431_v29, %v127_v24 }
  0x4d   :  { %v441_v21 = vpop.eup %440  ;;  %v180_v22 = vmul.f32 0.6931472, %v437_v18  ;;  %v245_v25 = vmul.f32 %v133_v3, %v583_v42  ;;  %v253_v48 = vsub.f32 1.0, %v133_v3  ;;  %v168_v8 = vsel %vm731_vm8, %v707_v12, %v162_v36 }
  0x4e   :  { %v443_v40 = vpop.eup %442  ;;  %v189_v11 = vmul.f32 0.6931472, %v439_v62  ;;  %v198_v50 = vmul.f32 0.6931472, %v441_v21  ;;  %v246_v1 = vmul.f32 %v134_v6, %v588_v46  ;;  %v247_v37 = vmul.f32 %v135_v49, %v590_v47 }
  0x4f   :  { %v445_v51 = vpop.eup %444  ;;  %v207_v26 = vmul.f32 0.6931472, %v443_v40  ;;  %v254_v16 = vsub.f32 1.0, %v134_v6  ;;  %v264_v29 = vmul.f32 %v937_v9, %v248_v54  ;;  %v177_v3 = vsel %vm746_vm9, %v715_v17, %v171_v61 }
  0x50   :  { %v447_v24 = vpop.eup %446  ;;  %v265_v12 = vmul.f32 %v938_v13, %v249_v30  ;;  %v939_v36 = vsub.f32 1.0, %v568_v34  ;;  %v940_v62 = vsub.f32 1.0, %v570_v35  ;;  %v186_v6 = vsel %vm764_vm10, %v722_v14, %v180_v22  ;;  %v945_v22 = vld [vmem:[#allocation22_spill] sm:$0xff] }
  0x51   :  { %v232_v32 = vadd.f32 %v168_v8, %v604_v56  ;;  %v255_v54 = vsub.f32 1.0, %v135_v49  ;;  %v941_v40 = vsub.f32 1.0, %v581_v41  ;;  %v195_v33 = vsel %vm778_vm11, %v728_v63, %v189_v11  ;;  %v949_v8 = vld [vmem:[#allocation20_spill] sm:$0xff] }
  0x52   :  { %v266_v18 = vmul.f32 %v939_v36, %v250_v60  ;;  %v267_v21 = vmul.f32 %v940_v62, %v251_v43  ;;  %v204_v34 = vsel %vm782_vm12, %v736_v38, %v198_v50  ;;  %v216_v35 = vmul.f32 0.6931472, %v445_v51  ;;  %v951_v50 = vld [vmem:[#allocation21_spill] sm:$0xff] }
  0x53   :  { %v268_v10 = vmul.f32 %v941_v40, %v252_v31  ;;  %v942_v17 = vsub.f32 1.0, %v583_v42  ;;  %v213_v56 = vsel %vm799_vm13, %v741_v15, %v207_v26  ;;  %v225_v14 = vmul.f32 0.6931472, %v447_v24  ;;  %v944_v42 = vld [vmem:[#allocation11_spill] sm:$0xff] }
  0x54   :  { %v233_v41 = vadd.f32 %v177_v3, %v606_v57  ;;  %v272_v39 = vadd.f32 %v264_v29, %v240_v2  ;;  %v943_v60 = vsub.f32 1.0, %v588_v46  ;;  %v273_v63 = vadd.f32 %v265_v12, %v241_v7  ;;  %v953_v3 = vld [vmem:[#allocation17_spill] sm:$0xff] }
  0x55   :  { %v269_v30 = vmul.f32 %v942_v17, %v253_v48  ;;  %v274_v43 = vadd.f32 %v266_v18, %v242_v27  ;;  %v275_v61 = vadd.f32 %v267_v21, %v243_v5  ;;  %v234_v38 = vadd.f32 %v186_v6, %v608_v58  ;;  %v955_v6 = vld [vmem:[#allocation18_spill] sm:$0xff]  ;;  %v958_v17 = vld [vmem:[#allocation24_spill] sm:$0xff] }
  0x56   :  { %v270_v0 = vmul.f32 %v943_v60, %v254_v16  ;;  %v235_v45 = vadd.f32 %v195_v33, %v610_v59  ;;  %v236_v31 = vadd.f32 %v204_v34, %v944_v42  ;;  %v276_v49 = vadd.f32 %v268_v10, %v244_v4  ;;  %v948_v4 = vld [vmem:[#allocation15_spill] sm:$0xff]  ;;  %v956_v33 = vld [vmem:[#allocation14_spill] sm:$0xff] }
  0x57   :  { %v222_v15 = vsel %vm814_vm14, %v945_v22, %v216_v35  ;;  %v237_v57 = vadd.f32 %v213_v56, %v946_v52  ;;  %v947_v2 = vsub.f32 1.0, %v590_v47  ;;  %v277_v16 = vadd.f32 %v269_v30, %v245_v25  ;;  %v957_v35 = vld [vmem:[#allocation19_spill] sm:$0xff] }
  0x58   :  { %v231_v7 = vsel %vm822_vm15, %v769_v55, %v225_v14  ;;  %v280_v58 = vsub.f32 1.0, %v272_v39  ;;  %v281_v27 = vsub.f32 1.0, %v273_v63  ;;  %v282_v59 = vsub.f32 1.0, %v274_v43 }
  0x59   :  { %v271_v46 = vmul.f32 %v947_v2, %v255_v54  ;;  %v278_v5 = vadd.f32 %v270_v0, %v246_v1  ;;  %v283_v48 = vsub.f32 1.0, %v275_v61  ;;  %v307_v11 = vadd.f32 %v949_v8, %v948_v4  ;;  %v954_v1 = vld [vmem:[#allocation23_spill] sm:$0xff] }
  0x5a   :  { %v308_v51 = vadd.f32 %v951_v50, %v950_v19  ;;  %v284_v26 = vsub.f32 1.0, %v276_v49  ;;  %v312_v47 = vmul.f32 %v788_v53, %v232_v32  ;;  %v313_v25 = vmul.f32 %v792_v20, %v233_v41 }
  0x5b   :  { %v314_v9 = vmul.f32 %v805_v23, %v234_v38  ;;  %v238_v55 = vadd.f32 %v222_v15, %v952_v44  ;;  %v279_v29 = vadd.f32 %v271_v46, %v247_v37  ;;  %v285_v24 = vsub.f32 1.0, %v277_v16 }
  0x5c   :  { %v309_v13 = vadd.f32 %v954_v1, %v953_v3  ;;  %v315_v12 = vmul.f32 %v307_v11, %v235_v45  ;;  %v320_v36 = vmul.f32 %v280_v58, %v280_v58  ;;  %v321_v18 = vmul.f32 %v281_v27, %v281_v27 }
  0x5d   :  { %v322_v62 = vmul.f32 %v282_v59, %v282_v59  ;;  %v286_v21 = vsub.f32 1.0, %v278_v5  ;;  %v310_v54 = vadd.f32 %v759_v28, %v955_v6  ;;  %v316_v53 = vmul.f32 %v308_v51, %v236_v31 }
  0x5e   :  { %v323_v32 = vmul.f32 %v283_v48, %v283_v48  ;;  %v324_v20 = vmul.f32 %v284_v26, %v284_v26  ;;  %v328_v40 = vmul.f32 %v320_v36, %v312_v47  ;;  %v329_v23 = vmul.f32 %v321_v18, %v313_v25 }
  0x5f   :  { %v330_v10 = vmul.f32 %v322_v62, %v314_v9  ;;  %v239_v37 = vadd.f32 %v231_v7, %v956_v33  ;;  %v287_v34 = vsub.f32 1.0, %v279_v29  ;;  %v311_v30 = vadd.f32 %v958_v17, %v957_v35 }
  0x60   :  { %v317_v56 = vmul.f32 %v309_v13, %v237_v57  ;;  %v325_v14 = vmul.f32 %v285_v24, %v285_v24  ;;  %v331_v41 = vmul.f32 %v323_v32, %v315_v12  ;;  %v371_v39 = vadd.f32 %v329_v23, %v328_v40 }
  0x61   :  { %v318_v60 = vmul.f32 %v310_v54, %v238_v55  ;;  %v326_v0 = vmul.f32 %v286_v21, %v286_v21  ;;  %v332_v63 = vmul.f32 %v324_v20, %v316_v53  ;;  %v319_v43 = vmul.f32 %v311_v30, %v239_v37 }
  0x62   :  { %v372_v28 = vadd.f32 %v371_v39, %v330_v10  ;;  %v327_v61 = vmul.f32 %v287_v34, %v287_v34  ;;  %v333_v38 = vmul.f32 %v325_v14, %v317_v56 }
  0x63   :  { %v334_v42 = vmul.f32 %v326_v0, %v318_v60 }
  0x64   :  { %v373_v45 = vadd.f32 %v372_v28, %v331_v41  ;;  %v335_v49 = vmul.f32 %v327_v61, %v319_v43 }
  0x66   :  { %v374_v31 = vadd.f32 %v373_v45, %v332_v63 }
  0x68   :  { %v375_v22 = vadd.f32 %v374_v31, %v333_v38 }
  0x6a   :  { %v376_v15 = vadd.f32 %v375_v22, %v334_v42 }
  0x6c   :  { %v377_v52 = vadd.f32 %v376_v15, %v335_v49 }
  0x6e   :  { %378 = vst [vmem:[#allocation7] sm:$0xff] %v377_v52 }
  0x6f   :  { %499 = shalt.err (!%p496_p0)
}
  0x70   :  { %388 = dma.vmem_to_hbm [thread:$0]  %s386_s1, 128, %s898_s2, [#allocation4]  }
  0x71   :  { %512 = dma.done.wait [#allocation4], 128  }
  0x72   :  { %513 = vsyncadd [#allocation4], 4294967168 }
  0x73   :  { %392 = vsyncpa [#allocation3], 1 }
  0x74   :  { %393 = vsyncpa [#allocation6], 1 }
  0x75   :  { %394 = vsyncpa [#allocation4], 1 }

</bundles_post_ra>
